<compile_context>
chip_gen: v5e
topology: v5e:2x2
jax: 0.10.0
libtpu: 0.0.40
codegen_flags: <defaults>
</compile_context>

<pallas_src>
import math
from functools import partial

import jax
import jax.numpy as jnp
from jax import lax
from jax.experimental import pallas as pl
from jax.experimental.pallas import tpu as pltpu


# ----------------------------------------------------------------------------
# Pallas fused matmul kernels: y = relu((x @ w) * scale + shift)
# ----------------------------------------------------------------------------
def _mm_affine_kernel(x_ref, w_ref, scale_ref, shift_ref, o_ref, *, relu):
    acc = jnp.dot(x_ref[...], w_ref[...], preferred_element_type=jnp.float32)
    acc = acc * scale_ref[...] + shift_ref[...]
    if relu:
        acc = jnp.maximum(acc, 0.0)
    o_ref[...] = acc.astype(o_ref.dtype)


def _mm_plain_kernel(x_ref, w_ref, o_ref, *, relu):
    acc = jnp.dot(x_ref[...], w_ref[...], preferred_element_type=jnp.float32)
    if relu:
        acc = jnp.maximum(acc, 0.0)
    o_ref[...] = acc.astype(o_ref.dtype)


# ----------------------------------------------------------------------------
# Tiling helpers (VMEM-budgeted; conservative enough for v7x's 64 MiB VMEM).
# ----------------------------------------------------------------------------
_VMEM_BUDGET = 24 * 1024 * 1024


def _aligned_divisors(dim, align):
    divs = [d for d in range(align, dim + 1, align) if dim % d == 0]
    return divs if divs else [dim]  # full dim is always a legal block size


def _choose_tiles(M, K, N, in_bytes, out_bytes, budget=_VMEM_BUDGET):
    m_divs = sorted(_aligned_divisors(M, 16), reverse=True)    # bf16 sublane align
    n_divs = sorted(_aligned_divisors(N, 128), reverse=True)   # lane align
    tm = next((d for d in m_divs if d <= 2048), m_divs[-1])
    tn = next((d for d in n_divs if d <= 2048), n_divs[-1])

    def cost(a, b):  # double-buffered input blocks + output block
        return 2 * ((a * K + K * b) * in_bytes + a * b * out_bytes)

    mi, ni = m_divs.index(tm), n_divs.index(tn)
    while cost(tm, tn) > budget:
        if mi + 1 < len(m_divs):
            mi += 1
            tm = m_divs[mi]
        elif ni + 1 < len(n_divs):
            ni += 1
            tn = n_divs[ni]
        else:
            break
    return tm, tn


# ----------------------------------------------------------------------------
# Fused matmul wrapper (Pallas) and pure-JAX reference with identical math.
# ----------------------------------------------------------------------------
def matmul_scale_shift(x, w, scale=None, shift=None, relu=False,
                       out_dtype=jnp.float32):
    """y = relu((x @ w) * scale + shift); x:(M,K), w:(K,N), scale/shift:(N,)."""
    M, K = x.shape
    K2, N = w.shape
    assert K == K2
    affine = (scale is not None) or (shift is not None)

    x = x.astype(jnp.bfloat16)
    w = w.astype(jnp.bfloat16)

    # Lane-dense out_spec: pad N to a multiple of 128 so stores are unmasked.
    Np = ((N + 127) // 128) * 128
    if Np != N:
        w = jnp.pad(w, ((0, 0), (0, Np - N)))

    if affine:
        scale = jnp.ones((N,), jnp.float32) if scale is None else scale
        shift = jnp.zeros((N,), jnp.float32) if shift is None else shift
        scale = jnp.pad(scale.astype(jnp.float32), (0, Np - N)).reshape(1, Np)
        shift = jnp.pad(shift.astype(jnp.float32), (0, Np - N)).reshape(1, Np)

    tm, tn = _choose_tiles(M, K, Np, in_bytes=2,
                           out_bytes=jnp.dtype(out_dtype).itemsize)
    grid = (M // tm, Np // tn)

    x_spec = pl.BlockSpec((tm, K), lambda i, j: (i, 0))
    w_spec = pl.BlockSpec((K, tn), lambda i, j: (0, j))
    v_spec = pl.BlockSpec((1, tn), lambda i, j: (0, j))
    o_spec = pl.BlockSpec((tm, tn), lambda i, j: (i, j))

    if affine:
        kernel = partial(_mm_affine_kernel, relu=relu)
        in_specs = [x_spec, w_spec, v_spec, v_spec]
        args = (x, w, scale, shift)
    else:
        kernel = partial(_mm_plain_kernel, relu=relu)
        in_specs = [x_spec, w_spec]
        args = (x, w)

    out = pl.pallas_call(
        kernel,
        out_shape=jax.ShapeDtypeStruct((M, Np), out_dtype),
        grid_spec=pltpu.PrefetchScalarGridSpec(
            num_scalar_prefetch=0,
            grid=grid,
            in_specs=in_specs,
            out_specs=o_spec,
        ),
        compiler_params=pltpu.CompilerParams(
            dimension_semantics=("parallel", "parallel"),
            vmem_limit_bytes=32 * 1024 * 1024),
    )(*args)
    return out[:, :N] if Np != N else out


def matmul_ref(x, w, scale=None, shift=None, relu=False, out_dtype=jnp.float32):
    """Pure-JAX reference with the same bf16-in / f32-accumulate math."""
    y = jnp.dot(x.astype(jnp.bfloat16), w.astype(jnp.bfloat16),
                preferred_element_type=jnp.float32)
    if scale is not None:
        y = y * scale.reshape(1, -1).astype(jnp.float32)
    if shift is not None:
        y = y + shift.reshape(1, -1).astype(jnp.float32)
    if relu:
        y = jnp.maximum(y, 0.0)
    return y.astype(out_dtype)


# ----------------------------------------------------------------------------
# Layers built on the matmul kernel.
# ----------------------------------------------------------------------------
def conv1x1(x_nhwc, w, mm, scale=None, shift=None, relu=False,
            out_dtype=jnp.bfloat16):
    """1x1 Conv2d (no bias). w has PyTorch layout (C_out, C_in, 1, 1)."""
    Nb, H, W, Ci = x_nhwc.shape
    Co = w.shape[0]
    wm = w.reshape(Co, Ci).T  # (Ci, Co)
    y = mm(x_nhwc.reshape(Nb * H * W, Ci), wm, scale=scale, shift=shift,
           relu=relu, out_dtype=out_dtype)
    return y.reshape(Nb, H, W, Co)


def conv_transpose_same(x_nhwc, w, stride, mm, out_dtype=jnp.bfloat16):
    """ConvTranspose2d(k=2*stride, stride, pad=stride//2, bias=False).

    w has PyTorch layout (C_in, C_out, k, k).  The channel->patch projection is a
    Pallas matmul with C_out lane-minor; the 2x2 patch overlap-add is 4 pads+adds
    (no scatter) plus a crop of the "same" padding.
    """
    Nb, H, W, Ci = x_nhwc.shape
    Ci2, Co, k, k2 = w.shape
    s = stride
    p = s // 2
    assert Ci2 == Ci and k == 2 * s and k2 == k

    # Flatten weight with columns ordered (ky, kx, co) -> Co lane-minor.
    w_flat = jnp.transpose(w, (0, 2, 3, 1)).reshape(Ci, k * k * Co)
    patches = mm(x_nhwc.reshape(Nb * H * W, Ci), w_flat,
                 out_dtype=out_dtype)                         # (M, k*k*Co)
    # ky = a*s + ly, kx = b*s + lx
    patches = patches.reshape(Nb, H, W, 2, s, 2, s, Co)

    # Overlap-add: out[i+a, j+b] += patches[i, j, a, :, b, :]  (4 shifted adds).
    acc = None
    for a in (0, 1):
        for b in (0, 1):
            part = patches[:, :, :, a, :, b, :, :]            # (Nb,H,W,s,s,Co)
            part = jnp.pad(part, ((0, 0), (a, 1 - a), (b, 1 - b),
                                  (0, 0), (0, 0), (0, 0)))
            acc = part if acc is None else acc + part
    # acc: (Nb, H+1, W+1, s, s, Co) indexed (i, j, ly, lx, co)
    acc = jnp.transpose(acc, (0, 1, 3, 2, 4, 5))              # (Nb,H+1,s,W+1,s,Co)
    out = acc.reshape(Nb, (H + 1) * s, (W + 1) * s, Co)
    return out[:, p:p + H * s, p:p + W * s, :]                # crop "same" padding


# ----------------------------------------------------------------------------
# PlanarSegHead forward (eval semantics) with algebraic weight folding.
# ----------------------------------------------------------------------------
def planar_seg_head_forward(params, e7, e6, e5, mm):
    x7 = jnp.transpose(e7, (0, 2, 3, 1))
    x6 = jnp.transpose(e6, (0, 2, 3, 1))
    x5 = jnp.transpose(e5, (0, 2, 3, 1))

    # drop1 / drop2: Dropout is identity in eval mode.
    # TODO(synk): training-mode dropout / BatchNorm batch-statistics not implemented.

    # fc_conv -> BN(eval) -> ReLU fused into one Pallas matmul.
    x = conv1x1(x7, params["fc_conv"], mm,
                scale=params["bn_scale"], shift=params["bn_shift"], relu=True,
                out_dtype=jnp.bfloat16)

    # clf1 then dec1 are consecutive linear maps (no nonlinearity between):
    # precompose their weights -> one deconv, one matmul fewer.
    w_clf1_dec1 = jnp.einsum(
        "oi,ocyx->icyx",
        params["clf1"].reshape(params["clf1"].shape[0], -1), params["dec1"])
    d6 = conv_transpose_same(x, w_clf1_dec1, 2, mm, out_dtype=jnp.bfloat16)

    d6_b = conv1x1(x6, params["clf2"], mm, out_dtype=jnp.bfloat16)
    d5 = conv_transpose_same(d6_b + d6, params["dec2"], 2, mm,
                             out_dtype=jnp.bfloat16)

    d5_b = conv1x1(x5, params["clf3"], mm, out_dtype=jnp.bfloat16)

    # fc_stage2 (1x1) commutes with the deconv overlap-add: fold it into dec3's
    # weight so the big stride-16 deconv emits num_classes channels directly and
    # the huge M x 5 (masked-store) matmul disappears.
    w_dec3_fc = jnp.einsum(
        "icyx,nc->inyx", params["dec3"],
        params["fc_stage2"].reshape(params["fc_stage2"].shape[0], -1))
    d = conv_transpose_same(d5_b + d5, w_dec3_fc, 16, mm, out_dtype=jnp.float32)

    return jnp.transpose(d, (0, 3, 1, 2))  # back to NCHW


def maxpool_3x3_s2_p1_nchw(x):
    """nn.MaxPool2d(kernel_size=3, stride=2, padding=1) on NCHW (XLA glue)."""
    return lax.reduce_window(
        x, -jnp.inf, lax.max,
        window_dimensions=(1, 1, 3, 3),
        window_strides=(1, 1, 2, 2),
        padding=((0, 0), (0, 0), (1, 1), (1, 1)))


def res_planar_seg_forward(params, e6, e5, mm):
    # TODO(synk): timm backbone not implemented; e6/e5 are its output features.
    e7 = maxpool_3x3_s2_p1_nchw(e6)
    return planar_seg_head_forward(params, e7, e6, e5, mm)


# ----------------------------------------------------------------------------
# Deterministic parameter init (shapes / init follow the PyTorch module).
# ----------------------------------------------------------------------------
def init_params(key, in_features, bottleneck, num_classes, in_features_clf3=None):
    if in_features_clf3 is None:
        in_features_clf3 = in_features // 2
    keys = jax.random.split(key, 8)

    def conv_w(k, cout, cin, ks):
        # nn.Conv2d init in the module: normal(0, sqrt(2 / (k*k*out)))
        n = ks * ks * cout
        return jax.random.normal(k, (cout, cin, ks, ks), jnp.float32) * math.sqrt(2.0 / n)

    def convT_w(k, cin, cout, ks):
        # ConvTranspose2d weight layout: (C_in, C_out, kH, kW)
        fan = cin * ks * ks
        return jax.random.normal(k, (cin, cout, ks, ks), jnp.float32) / math.sqrt(fan)

    params = {
        "fc_conv":   conv_w(keys[0], in_features, in_features, 1),
        "clf1":      conv_w(keys[1], bottleneck, in_features, 1),
        "clf2":      conv_w(keys[2], bottleneck, in_features, 1),
        "clf3":      conv_w(keys[3], bottleneck, in_features_clf3, 1),
        "dec1":      convT_w(keys[4], bottleneck, bottleneck, 4),
        "dec2":      convT_w(keys[5], bottleneck, bottleneck, 4),
        "dec3":      convT_w(keys[6], bottleneck, bottleneck, 32),
        "fc_stage2": conv_w(keys[7], num_classes, bottleneck, 1),
    }

    # BatchNorm2d(in_features), eval: gamma=1, beta=0, running_mean=0, running_var=1
    eps = 1e-5
    gamma = jnp.ones((in_features,), jnp.float32)
    beta = jnp.zeros((in_features,), jnp.float32)
    rmean = jnp.zeros((in_features,), jnp.float32)
    rvar = jnp.ones((in_features,), jnp.float32)
    scale = gamma / jnp.sqrt(rvar + eps)
    params["bn_scale"] = scale
    params["bn_shift"] = beta - rmean * scale
    return params


if __name__ == "__main__":
    key = jax.random.PRNGKey(0)
    kp, k6, k5 = jax.random.split(key, 3)

    batch = 2
    in_features = 64
    in_features_clf3 = 32
    bottleneck = 32
    num_classes = 5

    params = init_params(kp, in_features, bottleneck, num_classes, in_features_clf3)

    # Backbone feature maps: e6 (deepest, in_features ch), e5 (2x resolution,
    # in_features//2 ch); e7 = maxpool(e6) as in ResPlanarSegTimm.forward.
    e6 = jax.random.normal(k6, (batch, in_features, 8, 8), jnp.float32)
    e5 = jax.random.normal(k5, (batch, in_features_clf3, 16, 16), jnp.float32)

    out = res_planar_seg_forward(params, e6, e5, matmul_scale_shift)
    out = jax.block_until_ready(out)

    # Sanity check against a pure-JAX reference using the identical decomposition
    # (same folded weights, same bf16 casts, same overlap-add glue).
    ref = res_planar_seg_forward(params, e6, e5, matmul_ref)
    ref = jax.block_until_ready(ref)

    assert out.shape == (batch, num_classes, 16 * 16, 16 * 16), out.shape
    max_err = float(jnp.max(jnp.abs(out - ref)))
    assert jnp.allclose(out, ref, atol=2e-2, rtol=2e-2), f"mismatch vs ref: {max_err}"

    print("KERNEL_OK")
</pallas_src>

<mosaic_0001>
module attributes {stable_mosaic.version = 11 : i64} {
  func.func @_mm_affine_kernel(%arg0: i32, %arg1: i32, %arg2: memref<32x64xbf16, #tpu.memory_space<vmem>>, %arg3: memref<64x128xbf16, #tpu.memory_space<vmem>>, %arg4: memref<1x128xf32, #tpu.memory_space<vmem>>, %arg5: memref<1x128xf32, #tpu.memory_space<vmem>>, %arg6: memref<32x128xbf16, #tpu.memory_space<vmem>>) attributes {dimension_semantics = [#tpu.dimension_semantics<parallel>, #tpu.dimension_semantics<parallel>], iteration_bounds = array<i64: 1, 1>, scalar_prefetch = 0 : i64, scratch_operands = 0 : i64, tpu.core_type = #tpu.core_type<tc>, window_params = [{transform_indices = @transform_0, window_bounds = array<i64: 32, 64>}, {transform_indices = @transform_1, window_bounds = array<i64: 64, 128>}, {transform_indices = @transform_2, window_bounds = array<i64: 1, 128>}, {transform_indices = @transform_3, window_bounds = array<i64: 1, 128>}, {transform_indices = @transform_4, window_bounds = array<i64: 32, 128>}]} {
    %c0 = arith.constant 0 : index
    %c0_0 = arith.constant 0 : index
    %0 = vector.load %arg2[%c0, %c0_0] : memref<32x64xbf16, #tpu.memory_space<vmem>>, vector<32x64xbf16>
    %c0_1 = arith.constant 0 : index
    %c0_2 = arith.constant 0 : index
    %1 = vector.load %arg3[%c0_1, %c0_2] : memref<64x128xbf16, #tpu.memory_space<vmem>>, vector<64x128xbf16>
    %cst = arith.constant dense<0.000000e+00> : vector<32x128xf32>
    %2 = tpu.matmul %0, %1, %cst {dimension_numbers = #tpu.dot_dimension_numbers<[1], [0], [0], [1], [0, 0, 1, 1], [], []>} : vector<32x64xbf16>, vector<64x128xbf16>, vector<32x128xf32> -> vector<32x128xf32>
    %c0_3 = arith.constant 0 : index
    %c0_4 = arith.constant 0 : index
    %3 = vector.load %arg4[%c0_3, %c0_4] : memref<1x128xf32, #tpu.memory_space<vmem>>, vector<1x128xf32>
    %4 = vector.broadcast %3 : vector<1x128xf32> to vector<32x128xf32>
    %5 = arith.mulf %2, %4 : vector<32x128xf32>
    %c0_5 = arith.constant 0 : index
    %c0_6 = arith.constant 0 : index
    %6 = vector.load %arg5[%c0_5, %c0_6] : memref<1x128xf32, #tpu.memory_space<vmem>>, vector<1x128xf32>
    %7 = vector.broadcast %6 : vector<1x128xf32> to vector<32x128xf32>
    %8 = arith.addf %5, %7 : vector<32x128xf32>
    %cst_7 = arith.constant 0.000000e+00 : f32
    %9 = vector.broadcast %cst_7 : f32 to vector<32x128xf32>
    %10 = arith.maximumf %8, %9 : vector<32x128xf32>
    %11 = arith.truncf %10 : vector<32x128xf32> to vector<32x128xbf16>
    %c0_8 = arith.constant 0 : index
    %c0_9 = arith.constant 0 : index
    %12 = vector.load %arg6[%c0_8, %c0_9] : memref<32x128xbf16, #tpu.memory_space<vmem>>, vector<32x128xbf16>
    tpu.vector_store %arg6[%c0_8, %c0_9], %11 {strides = array<i32>} : memref<32x128xbf16, #tpu.memory_space<vmem>>, vector<32x128xbf16>,
    return
  }
  func.func @transform_0(%arg0: i32, %arg1: i32) -> (i32, i32) {
    %c0_i32 = arith.constant 0 : i32
    %c0_i32_0 = arith.constant 0 : i32
    return %arg0, %c0_i32 : i32, i32
  }
  func.func @transform_1(%arg0: i32, %arg1: i32) -> (i32, i32) {
    %c0_i32 = arith.constant 0 : i32
    %c0_i32_0 = arith.constant 0 : i32
    return %c0_i32, %arg1 : i32, i32
  }
  func.func @transform_2(%arg0: i32, %arg1: i32) -> (i32, i32) {
    %c0_i32 = arith.constant 0 : i32
    %c0_i32_0 = arith.constant 0 : i32
    return %c0_i32, %arg1 : i32, i32
  }
  func.func @transform_3(%arg0: i32, %arg1: i32) -> (i32, i32) {
    %c0_i32 = arith.constant 0 : i32
    %c0_i32_0 = arith.constant 0 : i32
    return %c0_i32, %arg1 : i32, i32
  }
  func.func @transform_4(%arg0: i32, %arg1: i32) -> (i32, i32) {
    %c0_i32 = arith.constant 0 : i32
    return %arg0, %arg1 : i32, i32
  }
}

</mosaic_0001>

<bundles_post_ra>
// kernel: tpu_custom_call.1
= control target key start
LH: loop header
LB: loop body
LE: loop exit
PB: predicated region body
PF: predicated region fallthrough
CT: control target
= control target key end

     0   :  { %9 = vsyncpa [#allocation3], 0  ;;  %s357_s0 = inlined_call_operand.hbm [shape: bf16[32,64], index: 0, kind: input, shape index: {}]   ;;  %s358_s1 = inlined_call_operand.hbm [shape: bf16[64,128], index: 1, kind: input, shape index: {}]   ;;  %s359_s2 = inlined_call_operand.vmem [shape: f32[1,128], index: 2, kind: input, shape index: {}]   ;;  %s360_s3 = inlined_call_operand.vmem [shape: f32[1,128], index: 3, kind: input, shape index: {}]   ;;  %s361_s4 = inlined_call_operand.hbm [shape: bf16[32,128], index: 4, kind: output, shape index: {}]  }
   0x1   :  { %10 = vsyncpa [#allocation6], 0 }
   0x2   :  { %11 = vsyncpa [#allocation4], 0  ;;  %s16_s17 = sshll.u32 %s357_s0, 4  ;;  %s303_s18 = smov [#allocation2]   ;;  %s17_s17 = int_to_ptr.hbm [resolvable:$true] %s16_s17 }
   0x3   :  { %s18_s19 = sshll.u32 %s303_s18, 4  ;;  %s29_s22 = sshll.u32 %s358_s1, 4  ;;  %s19_s19 = int_to_ptr.vmem [resolvable:$true] %s18_s19  ;;  %s30_s22 = int_to_ptr.hbm [resolvable:$true] %s29_s22 }
   0x4   :  { %s304_s23 = smov 64   ;;  %s305_s24 = smov 4  }
   0x5   :  { %24 = dma.hbm_to_vmem [thread:$0]  %s17_s17, 256, %s19_s19, [#allocation3], %s304_s23, %s304_s23, %s305_s24  }
   0x6   :  { %s306_s25 = smov [#allocation5]  }
   0x7   :  { %s31_s26 = sshll.u32 %s306_s25, 4  ;;  %s32_s26 = int_to_ptr.vmem [resolvable:$true] %s31_s26 }
   0x8   :  { %37 = dma.hbm_to_vmem [thread:$0]  %s30_s22, 512, %s32_s26, [#allocation6], %s304_s23, %s304_s23, %s305_s24  }
   0x9   :  { %297 = dma.done.wait [#allocation3], 256  }
   0xa   :  { %298 = vsyncadd [#allocation3], 4294967040 }
   0xb   :  { %299 = dma.done.wait [#allocation6], 512  }
   0xc   :  { %300 = vsyncadd [#allocation6], 4294966784  ;;  %v202_v0 = vld [vmem:[#allocation5 + $0x18] sm:$0xff]  ;;  %v201_v1 = vld [vmem:[#allocation5 + $0x10] sm:$0xff]  ;;  %vm97_vm0 = vcmask 523264   ;;  %s307_s29 = smov [#allocation7]  }
   0xd   :  { %108 = vmatpush.bf16.msra.mxu0 %v202_v0  ;;  %214 = vmatpush.bf16.msra.mxu1 %v202_v0  ;;  %v200_v2 = vld [vmem:[#allocation5 + $0x8] sm:$0xff]  ;;  %v199_v3 = vld [vmem:[#allocation5] sm:$0xff]  ;;  %v197_v4 = vld [vmem:[#allocation2] sm:$0xff]  ;;  %s157_s6 = sshll.u32 %s361_s4, 4  ;;  %s158_s6 = int_to_ptr.hbm [resolvable:$true] %s157_s6 }
   0xe   :  { %v198_v5 = vld [vmem:[#allocation2 + $0x8] sm:$0xff]  ;;  %v223_v8 = vld [vmem:[%s359_s2] ss:$0 sm:$0xff]  ;;  %s155_s2 = sshll.u32 %s307_s29, 4  ;;  %s156_s2 = int_to_ptr.vmem [resolvable:$true] %s155_s2 }
   0xf   :  { %v224_v10 = vld [vmem:[%s360_s3] ss:$0 sm:$0xff] }
  0x11   :  { %109 = vmatpush.bf16.msra.mxu0 %v201_v1  ;;  %215 = vmatpush.bf16.msra.mxu1 %v201_v1 }
  0x15   :  { %110 = vmatpush.bf16.msra.mxu0 %v200_v2  ;;  %216 = vmatpush.bf16.msra.mxu1 %v200_v2 }
  0x19   :  { %111 = vmatpush.bf16.msra.mxu0 %v199_v3  ;;  %217 = vmatpush.bf16.msra.mxu1 %v199_v3 }
  0x1c   :  { %195 = vmatmul.msk.bf16.vlgmr.msra.gmra.mxu0 %vm97_vm0, %v197_v4  ;;  %196 = vmatmul.msk.bf16.vlgmr.msra.gmra.mxu1 %vm97_vm0, %v198_v5 }
  0x99   :  { %v113_v6 = vpop.f32.mrf.mxu0  ;;  %v118_v7 = vpop.f32.mrf.mxu1 }
  0x9a   :  { %v127_v9 = vmul.f32 %v223_v8, %v113_v6  ;;  %v129_v11 = vmul.f32 %v223_v8, %v118_v7 }
  0x9c   :  { %v135_v14 = vadd.f32 %v224_v10, %v127_v9  ;;  %v137_v15 = vadd.f32 %v224_v10, %v129_v11 }
  0x9e   :  { %v139_v20 = vmax.f32 %v135_v14, 0.0  ;;  %v141_v21 = vmax.f32 %v137_v15, 0.0 }
  0xa1   :  { %v115_v12 = vpop.f32.mrf.mxu0  ;;  %v120_v13 = vpop.f32.mrf.mxu1 }
  0xa2   :  { %v128_v16 = vmul.f32 %v223_v8, %v115_v12  ;;  %v130_v17 = vmul.f32 %v223_v8, %v120_v13 }
  0xa4   :  { %v136_v18 = vadd.f32 %v224_v10, %v128_v16  ;;  %v138_v19 = vadd.f32 %v224_v10, %v130_v17 }
  0xa6   :  { %v140_v22 = vmax.f32 %v136_v18, 0.0  ;;  %v142_v23 = vmax.f32 %v138_v19, 0.0 }
  0xa8   :  { %v206_v24 = vpack.c.bf16 %v140_v22, %v139_v20  ;;  %v211_v25 = vpack.c.bf16 %v142_v23, %v141_v21 }
  0xaa   :  { %207 = vst [vmem:[#allocation7] sm:$0xff] %v206_v24  }
  0xab   :  { %213 = vst [vmem:[#allocation7 + $0x8] sm:$0xff] %v211_v25  }
  0xac   :  { %163 = dma.vmem_to_hbm [thread:$0]  %s156_s2, 256, %s158_s6, [#allocation4], %s304_s23, %s304_s23, %s305_s24  }
  0xad   :  { %301 = dma.done.wait [#allocation4], 256  }
  0xae   :  { %302 = vsyncadd [#allocation4], 4294967040 }
  0xaf   :  { %168 = vsyncpa [#allocation3], 1 }
  0xb0   :  { %169 = vsyncpa [#allocation6], 1 }
  0xb1   :  { %170 = vsyncpa [#allocation4], 1 }

</bundles_post_ra>
